<compile_context>
chip_gen: v5e
topology: v5e:2x2
jax: 0.10.0
libtpu: 0.0.40
codegen_flags: <defaults>
</compile_context>

<pallas_src>
import functools

import jax
import jax.numpy as jnp
from jax import lax
from jax.experimental import pallas as pl
from jax.experimental.pallas import tpu as pltpu


# -----------------------------------------------------------------------------
# Fused attention kernel: qkv linear + per-head softmax attention + proj linear
# -----------------------------------------------------------------------------
def _fused_attention_kernel(x_ref, wqkv_ref, bqkv_ref, wproj_ref, bproj_ref,
                            y_ref, attn_ref, *, num_heads, head_dim, scale,
                            n_search, compute_dtype):
    N, C = x_ref.shape
    H, D, Ns = num_heads, head_dim, n_search
    s0 = N - Ns  # first search token (= 2 * t_h * t_w)

    # ---- QKV projection: one large lane-dense (N, C) x (C, 3C) matmul
    #      (bf16 MXU inputs, f32 accumulation)
    x = x_ref[...].astype(compute_dtype)
    wqkv = wqkv_ref[...].astype(compute_dtype)
    qkv = jnp.dot(x, wqkv, preferred_element_type=jnp.float32) + bqkv_ref[...]  # (N, 3C) f32

    wproj = wproj_ref[...].astype(compute_dtype)

    # ---- per-head attention, fully unrolled inside this single kernel
    #      invocation (no grid-step overhead; probabilities never leave VMEM
    #      except the search x search sub-block the module returns)
    ctx_heads = []
    for h in range(H):
        # fold the softmax scale into q (N x D f32 multiply, not N x N)
        q = (qkv[:, h * D:(h + 1) * D] * scale).astype(compute_dtype)           # (N, D)
        k = qkv[:, C + h * D:C + (h + 1) * D].astype(compute_dtype)             # (N, D)
        v = qkv[:, 2 * C + h * D:2 * C + (h + 1) * D].astype(compute_dtype)     # (N, D)

        # q @ k^T without materializing a transpose (MXU trans_b contraction)
        s = lax.dot_general(q, k, (((1,), (1,)), ((), ())),
                            preferred_element_type=jnp.float32)                  # (N, N) f32
        m = jnp.max(s, axis=-1, keepdims=True)
        e = jnp.exp(s - m)
        denom = jnp.sum(e, axis=-1, keepdims=True)
        p = e * pl.reciprocal(denom, approx=True)                                 # f32 probs

        # only the returned attn_map[:, :, s0:, s0:] block is stored to HBM
        attn_ref[h] = p[s0:, s0:].astype(attn_ref.dtype)

        ctx_heads.append(
            jnp.dot(p.astype(compute_dtype), v,
                    preferred_element_type=jnp.float32))                          # (N, D) f32

    ctx = jnp.concatenate(ctx_heads, axis=-1).astype(compute_dtype)               # (N, C)

    # ---- output projection: one (N, C) x (C, C) matmul
    y = jnp.dot(ctx, wproj, preferred_element_type=jnp.float32) + bproj_ref[...]
    y_ref[...] = y.astype(y_ref.dtype)


def attention_forward(params, x, t_h, t_w, num_heads, policy=None,
                      compute_dtype=jnp.bfloat16):
    """Pallas version of tetrack_vit.Attention.forward (policy=None branch).

    x: (B, N, C) with the first 2*t_h*t_w tokens being template tokens.
    Returns (y (B,N,C) f32, attn_map[:, :, 2*t_h*t_w:, 2*t_h*t_w:] (B,H,Ns,Ns) f32).
    """
    # TODO(synk): policy-reweighted path ((attn + attn*policy)/2) not implemented;
    # only the module's default policy=None branch is supported.
    assert policy is None

    B, N, C = x.shape
    assert C % num_heads == 0, "dim should be divisible by num_heads"
    D = C // num_heads
    Ns = N - 2 * t_h * t_w
    scale = float(D) ** -0.5

    w_qkv = params["w_qkv"]                                     # (C, 3C), bf16 storage
    b_qkv = params["b_qkv"].reshape(1, 3 * C).astype(jnp.float32)
    w_proj = params["w_proj"]                                   # (C, C), bf16 storage
    b_proj = params["b_proj"].reshape(1, C).astype(jnp.float32)

    flops = 2 * B * (N * C * 3 * C                 # qkv projection
                     + num_heads * 2 * N * N * D   # scores + probs @ v
                     + N * C * C)                  # output projection
    transcendentals = B * num_heads * N * N        # exp (+ approx reciprocal)
    bytes_accessed = (x.size * x.dtype.itemsize
                      + w_qkv.size * w_qkv.dtype.itemsize
                      + b_qkv.size * 4
                      + w_proj.size * w_proj.dtype.itemsize
                      + b_proj.size * 4
                      + B * N * C * 4                     # y out
                      + B * num_heads * Ns * Ns * 4)      # attn sub-block out

    kernel = functools.partial(
        _fused_attention_kernel,
        num_heads=num_heads, head_dim=D, scale=scale, n_search=Ns,
        compute_dtype=compute_dtype)

    y, attn_search = pl.pallas_call(
        kernel,
        grid=(B,),
        in_specs=[
            pl.BlockSpec((pl.Squeezed(), N, C), lambda b: (b, 0, 0)),    # x
            pl.BlockSpec((C, 3 * C), lambda b: (0, 0)),                  # w_qkv
            pl.BlockSpec((1, 3 * C), lambda b: (0, 0)),                  # b_qkv
            pl.BlockSpec((C, C), lambda b: (0, 0)),                      # w_proj
            pl.BlockSpec((1, C), lambda b: (0, 0)),                      # b_proj
        ],
        out_specs=(
            pl.BlockSpec((pl.Squeezed(), N, C), lambda b: (b, 0, 0)),
            pl.BlockSpec((pl.Squeezed(), num_heads, Ns, Ns),
                         lambda b: (b, 0, 0, 0)),
        ),
        out_shape=(
            jax.ShapeDtypeStruct((B, N, C), jnp.float32),
            jax.ShapeDtypeStruct((B, num_heads, Ns, Ns), jnp.float32),
        ),
        compiler_params=pltpu.CompilerParams(
            dimension_semantics=("parallel",)),
        cost_estimate=pl.CostEstimate(
            flops=flops, transcendentals=transcendentals,
            bytes_accessed=bytes_accessed),
    )(x, w_qkv, b_qkv, w_proj, b_proj)
    return y, attn_search


# -----------------------------------------------------------------------------
# Pure-JAX reference (f32) mirroring the PyTorch module
# -----------------------------------------------------------------------------
def reference_attention(params, x, t_h, t_w, num_heads):
    B, N, C = x.shape
    D = C // num_heads
    scale = float(D) ** -0.5
    w_qkv = params["w_qkv"].astype(jnp.float32)
    w_proj = params["w_proj"].astype(jnp.float32)

    qkv = x @ w_qkv + params["b_qkv"]
    qkv = qkv.reshape(B, N, 3, num_heads, D).transpose(2, 0, 3, 1, 4)
    q, k, v = qkv[0], qkv[1], qkv[2]
    attn = jnp.einsum("bhqd,bhkd->bhqk", q, k) * scale
    attn = jax.nn.softmax(attn, axis=-1)
    ctx = jnp.einsum("bhqk,bhkd->bhqd", attn, v)
    ctx = ctx.transpose(0, 2, 1, 3).reshape(B, N, C)
    y = ctx @ w_proj + params["b_proj"]
    s0 = 2 * t_h * t_w
    return y, attn[:, :, s0:, s0:]


if __name__ == "__main__":
    B, num_heads, C = 2, 4, 64
    t_h = t_w = 2                 # 2 * t_h * t_w = 8 template tokens
    Ns = 16                       # search tokens (4 x 4)
    N = 2 * t_h * t_w + Ns        # 24 tokens total

    key = jax.random.PRNGKey(0)
    kx, k1, k2, k3 = jax.random.split(key, 4)
    x = jax.random.normal(kx, (B, N, C), jnp.float32)
    params = {
        # bf16 weight storage: halves HBM/VMEM traffic and feeds the MXU directly
        "w_qkv": (0.05 * jax.random.normal(k1, (C, 3 * C), jnp.float32)).astype(jnp.bfloat16),
        "b_qkv": jnp.zeros((3 * C,), jnp.float32),          # qkv_bias=False (module default)
        "w_proj": (0.05 * jax.random.normal(k2, (C, C), jnp.float32)).astype(jnp.bfloat16),
        "b_proj": 0.05 * jax.random.normal(k3, (C,), jnp.float32),
    }

    y, attn_search = attention_forward(params, x, t_h, t_w, num_heads)
    jax.block_until_ready(y)
    jax.block_until_ready(attn_search)

    assert y.shape == (B, N, C)
    assert attn_search.shape == (B, num_heads, Ns, Ns)

    # correctness vs f32 reference (kernel uses bf16 MXU inputs + approx reciprocal)
    y_ref, attn_ref = reference_attention(params, x, t_h, t_w, num_heads)
    err_y = float(jnp.max(jnp.abs(y - y_ref)))
    err_a = float(jnp.max(jnp.abs(attn_search - attn_ref)))
    assert err_a <= 2e-3, f"attn_map mismatch: {err_a}"
    assert err_y <= 1e-2, f"output mismatch: {err_y}"

    print("KERNEL_OK")
</pallas_src>

<mosaic_0001>
module attributes {stable_mosaic.version = 11 : i64} {
  func.func @_fused_attention_kernel(%arg0: i32, %arg1: memref<1x24x64xf32, #tpu.memory_space<vmem>>, %arg2: memref<64x192xbf16, #tpu.memory_space<vmem>>, %arg3: memref<1x192xf32, #tpu.memory_space<vmem>>, %arg4: memref<64x64xbf16, #tpu.memory_space<vmem>>, %arg5: memref<1x64xf32, #tpu.memory_space<vmem>>, %arg6: memref<1x24x64xf32, #tpu.memory_space<vmem>>, %arg7: memref<1x4x16x16xf32, #tpu.memory_space<vmem>>) attributes {dimension_semantics = [#tpu.dimension_semantics<parallel>], iteration_bounds = array<i64: 2>, scalar_prefetch = 0 : i64, scratch_operands = 0 : i64, tpu.core_type = #tpu.core_type<tc>, window_params = [{transform_indices = @transform_0, window_bounds = array<i64: 1, 24, 64>}, {pipeline_mode = #tpu.pipeline_mode<synchronous>, transform_indices = @transform_1, window_bounds = array<i64: 64, 192>}, {pipeline_mode = #tpu.pipeline_mode<synchronous>, transform_indices = @transform_2, window_bounds = array<i64: 1, 192>}, {pipeline_mode = #tpu.pipeline_mode<synchronous>, transform_indices = @transform_3, window_bounds = array<i64: 64, 64>}, {pipeline_mode = #tpu.pipeline_mode<synchronous>, transform_indices = @transform_4, window_bounds = array<i64: 1, 64>}, {transform_indices = @transform_5, window_bounds = array<i64: 1, 24, 64>}, {transform_indices = @transform_6, window_bounds = array<i64: 1, 4, 16, 16>}]} {
    %c0 = arith.constant 0 : index
    %c0_0 = arith.constant 0 : index
    %c0_1 = arith.constant 0 : index
    %0 = vector.load %arg1[%c0, %c0_0, %c0_1] : memref<1x24x64xf32, #tpu.memory_space<vmem>>, vector<1x24x64xf32>
    %1 = vector.shape_cast %0 : vector<1x24x64xf32> to vector<24x64xf32>
    %2 = arith.truncf %1 : vector<24x64xf32> to vector<24x64xbf16>
    %c0_2 = arith.constant 0 : index
    %c0_3 = arith.constant 0 : index
    %3 = vector.load %arg2[%c0_2, %c0_3] : memref<64x192xbf16, #tpu.memory_space<vmem>>, vector<64x192xbf16>
    %cst = arith.constant dense<0.000000e+00> : vector<24x192xf32>
    %4 = tpu.matmul %2, %3, %cst {dimension_numbers = #tpu.dot_dimension_numbers<[1], [0], [0], [1], [0, 0, 1, 1], [], []>} : vector<24x64xbf16>, vector<64x192xbf16>, vector<24x192xf32> -> vector<24x192xf32>
    %c0_4 = arith.constant 0 : index
    %c0_5 = arith.constant 0 : index
    %5 = vector.load %arg3[%c0_4, %c0_5] : memref<1x192xf32, #tpu.memory_space<vmem>>, vector<1x192xf32>
    %6 = vector.broadcast %5 : vector<1x192xf32> to vector<24x192xf32>
    %7 = arith.addf %4, %6 : vector<24x192xf32>
    %c0_6 = arith.constant 0 : index
    %c0_7 = arith.constant 0 : index
    %8 = vector.load %arg4[%c0_6, %c0_7] : memref<64x64xbf16, #tpu.memory_space<vmem>>, vector<64x64xbf16>
    %9 = vector.extract_strided_slice %7 {offsets = [0, 0], sizes = [24, 16], strides = [1, 1]} : vector<24x192xf32> to vector<24x16xf32>
    %cst_8 = arith.constant 2.500000e-01 : f32
    %10 = vector.broadcast %cst_8 : f32 to vector<24x16xf32>
    %11 = arith.mulf %9, %10 : vector<24x16xf32>
    %12 = arith.truncf %11 : vector<24x16xf32> to vector<24x16xbf16>
    %13 = vector.extract_strided_slice %7 {offsets = [0, 64], sizes = [24, 16], strides = [1, 1]} : vector<24x192xf32> to vector<24x16xf32>
    %14 = arith.truncf %13 : vector<24x16xf32> to vector<24x16xbf16>
    %15 = vector.extract_strided_slice %7 {offsets = [0, 128], sizes = [24, 16], strides = [1, 1]} : vector<24x192xf32> to vector<24x16xf32>
    %16 = arith.truncf %15 : vector<24x16xf32> to vector<24x16xbf16>
    %cst_9 = arith.constant dense<0.000000e+00> : vector<24x24xf32>
    %17 = tpu.matmul %12, %14, %cst_9 {dimension_numbers = #tpu.dot_dimension_numbers<[1], [1], [0], [0], [0, 0, 1, 0], [], []>} : vector<24x16xbf16>, vector<24x16xbf16>, vector<24x24xf32> -> vector<24x24xf32>
    %cst_10 = arith.constant dense<0xFF800000> : vector<24xf32>
    %18 = vector.multi_reduction <maximumf>, %17, %cst_10 [1] : vector<24x24xf32> to vector<24xf32>
    %19 = vector.shape_cast %18 : vector<24xf32> to vector<24x1xf32>
    %20 = vector.broadcast %19 : vector<24x1xf32> to vector<24x24xf32>
    %21 = arith.subf %17, %20 : vector<24x24xf32>
    %22 = math.exp %21 : vector<24x24xf32>
    %cst_11 = arith.constant dense<0.000000e+00> : vector<24xf32>
    %23 = vector.multi_reduction <add>, %22, %cst_11 [1] : vector<24x24xf32> to vector<24xf32>
    %24 = vector.shape_cast %23 : vector<24xf32> to vector<24x1xf32>
    %25 = tpu.reciprocal %24 {approx = true} : vector<24x1xf32> -> vector<24x1xf32>
    %26 = vector.broadcast %25 : vector<24x1xf32> to vector<24x24xf32>
    %27 = arith.mulf %22, %26 : vector<24x24xf32>
    %28 = vector.extract_strided_slice %27 {offsets = [8, 8], sizes = [16, 16], strides = [1, 1]} : vector<24x24xf32> to vector<16x16xf32>
    %c0_12 = arith.constant 0 : index
    %c0_13 = arith.constant 0 : index
    %c0_14 = arith.constant 0 : index
    %c0_15 = arith.constant 0 : index
    %29 = vector.load %arg7[%c0_12, %c0_13, %c0_14, %c0_15] : memref<1x4x16x16xf32, #tpu.memory_space<vmem>>, vector<1x1x16x16xf32>
    %30 = vector.shape_cast %29 : vector<1x1x16x16xf32> to vector<16x16xf32>
    %31 = vector.shape_cast %28 : vector<16x16xf32> to vector<1x1x16x16xf32>
    tpu.vector_store %arg7[%c0_12, %c0_13, %c0_14, %c0_15], %31 {strides = array<i32>} : memref<1x4x16x16xf32, #tpu.memory_space<vmem>>, vector<1x1x16x16xf32>,
    %32 = arith.truncf %27 : vector<24x24xf32> to vector<24x24xbf16>
    %cst_16 = arith.constant dense<0.000000e+00> : vector<24x16xf32>
    %33 = tpu.matmul %32, %16, %cst_16 {dimension_numbers = #tpu.dot_dimension_numbers<[1], [0], [0], [1], [0, 0, 1, 1], [], []>} : vector<24x24xbf16>, vector<24x16xbf16>, vector<24x16xf32> -> vector<24x16xf32>
    %34 = vector.extract_strided_slice %7 {offsets = [0, 16], sizes = [24, 16], strides = [1, 1]} : vector<24x192xf32> to vector<24x16xf32>
    %cst_17 = arith.constant 2.500000e-01 : f32
    %35 = vector.broadcast %cst_17 : f32 to vector<24x16xf32>
    %36 = arith.mulf %34, %35 : vector<24x16xf32>
    %37 = arith.truncf %36 : vector<24x16xf32> to vector<24x16xbf16>
    %38 = vector.extract_strided_slice %7 {offsets = [0, 80], sizes = [24, 16], strides = [1, 1]} : vector<24x192xf32> to vector<24x16xf32>
    %39 = arith.truncf %38 : vector<24x16xf32> to vector<24x16xbf16>
    %40 = vector.extract_strided_slice %7 {offsets = [0, 144], sizes = [24, 16], strides = [1, 1]} : vector<24x192xf32> to vector<24x16xf32>
    %41 = arith.truncf %40 : vector<24x16xf32> to vector<24x16xbf16>
    %cst_18 = arith.constant dense<0.000000e+00> : vector<24x24xf32>
    %42 = tpu.matmul %37, %39, %cst_18 {dimension_numbers = #tpu.dot_dimension_numbers<[1], [1], [0], [0], [0, 0, 1, 0], [], []>} : vector<24x16xbf16>, vector<24x16xbf16>, vector<24x24xf32> -> vector<24x24xf32>
    %cst_19 = arith.constant dense<0xFF800000> : vector<24xf32>
    %43 = vector.multi_reduction <maximumf>, %42, %cst_19 [1] : vector<24x24xf32> to vector<24xf32>
    %44 = vector.shape_cast %43 : vector<24xf32> to vector<24x1xf32>
    %45 = vector.broadcast %44 : vector<24x1xf32> to vector<24x24xf32>
    %46 = arith.subf %42, %45 : vector<24x24xf32>
    %47 = math.exp %46 : vector<24x24xf32>
    %cst_20 = arith.constant dense<0.000000e+00> : vector<24xf32>
    %48 = vector.multi_reduction <add>, %47, %cst_20 [1] : vector<24x24xf32> to vector<24xf32>
    %49 = vector.shape_cast %48 : vector<24xf32> to vector<24x1xf32>
    %50 = tpu.reciprocal %49 {approx = true} : vector<24x1xf32> -> vector<24x1xf32>
    %51 = vector.broadcast %50 : vector<24x1xf32> to vector<24x24xf32>
    %52 = arith.mulf %47, %51 : vector<24x24xf32>
    %53 = vector.extract_strided_slice %52 {offsets = [8, 8], sizes = [16, 16], strides = [1, 1]} : vector<24x24xf32> to vector<16x16xf32>
    %c0_21 = arith.constant 0 : index
    %c1 = arith.constant 1 : index
    %c0_22 = arith.constant 0 : index
    %c0_23 = arith.constant 0 : index
    %54 = vector.load %arg7[%c0_21, %c1, %c0_22, %c0_23] : memref<1x4x16x16xf32, #tpu.memory_space<vmem>>, vector<1x1x16x16xf32>
    %55 = vector.shape_cast %54 : vector<1x1x16x16xf32> to vector<16x16xf32>
    %56 = vector.shape_cast %53 : vector<16x16xf32> to vector<1x1x16x16xf32>
    tpu.vector_store %arg7[%c0_21, %c1, %c0_22, %c0_23], %56 {strides = array<i32>} : memref<1x4x16x16xf32, #tpu.memory_space<vmem>>, vector<1x1x16x16xf32>,
    %57 = arith.truncf %52 : vector<24x24xf32> to vector<24x24xbf16>
    %cst_24 = arith.constant dense<0.000000e+00> : vector<24x16xf32>
    %58 = tpu.matmul %57, %41, %cst_24 {dimension_numbers = #tpu.dot_dimension_numbers<[1], [0], [0], [1], [0, 0, 1, 1], [], []>} : vector<24x24xbf16>, vector<24x16xbf16>, vector<24x16xf32> -> vector<24x16xf32>
    %59 = vector.extract_strided_slice %7 {offsets = [0, 32], sizes = [24, 16], strides = [1, 1]} : vector<24x192xf32> to vector<24x16xf32>
    %cst_25 = arith.constant 2.500000e-01 : f32
    %60 = vector.broadcast %cst_25 : f32 to vector<24x16xf32>
    %61 = arith.mulf %59, %60 : vector<24x16xf32>
    %62 = arith.truncf %61 : vector<24x16xf32> to vector<24x16xbf16>
    %63 = vector.extract_strided_slice %7 {offsets = [0, 96], sizes = [24, 16], strides = [1, 1]} : vector<24x192xf32> to vector<24x16xf32>
    %64 = arith.truncf %63 : vector<24x16xf32> to vector<24x16xbf16>
    %65 = vector.extract_strided_slice %7 {offsets = [0, 160], sizes = [24, 16], strides = [1, 1]} : vector<24x192xf32> to vector<24x16xf32>
    %66 = arith.truncf %65 : vector<24x16xf32> to vector<24x16xbf16>
    %cst_26 = arith.constant dense<0.000000e+00> : vector<24x24xf32>
    %67 = tpu.matmul %62, %64, %cst_26 {dimension_numbers = #tpu.dot_dimension_numbers<[1], [1], [0], [0], [0, 0, 1, 0], [], []>} : vector<24x16xbf16>, vector<24x16xbf16>, vector<24x24xf32> -> vector<24x24xf32>
    %cst_27 = arith.constant dense<0xFF800000> : vector<24xf32>
    %68 = vector.multi_reduction <maximumf>, %67, %cst_27 [1] : vector<24x24xf32> to vector<24xf32>
    %69 = vector.shape_cast %68 : vector<24xf32> to vector<24x1xf32>
    %70 = vector.broadcast %69 : vector<24x1xf32> to vector<24x24xf32>
    %71 = arith.subf %67, %70 : vector<24x24xf32>
    %72 = math.exp %71 : vector<24x24xf32>
    %cst_28 = arith.constant dense<0.000000e+00> : vector<24xf32>
    %73 = vector.multi_reduction <add>, %72, %cst_28 [1] : vector<24x24xf32> to vector<24xf32>
    %74 = vector.shape_cast %73 : vector<24xf32> to vector<24x1xf32>
    %75 = tpu.reciprocal %74 {approx = true} : vector<24x1xf32> -> vector<24x1xf32>
    %76 = vector.broadcast %75 : vector<24x1xf32> to vector<24x24xf32>
    %77 = arith.mulf %72, %76 : vector<24x24xf32>
    %78 = vector.extract_strided_slice %77 {offsets = [8, 8], sizes = [16, 16], strides = [1, 1]} : vector<24x24xf32> to vector<16x16xf32>
    %c0_29 = arith.constant 0 : index
    %c2 = arith.constant 2 : index
    %c0_30 = arith.constant 0 : index
    %c0_31 = arith.constant 0 : index
    %79 = vector.load %arg7[%c0_29, %c2, %c0_30, %c0_31] : memref<1x4x16x16xf32, #tpu.memory_space<vmem>>, vector<1x1x16x16xf32>
    %80 = vector.shape_cast %79 : vector<1x1x16x16xf32> to vector<16x16xf32>
    %81 = vector.shape_cast %78 : vector<16x16xf32> to vector<1x1x16x16xf32>
    tpu.vector_store %arg7[%c0_29, %c2, %c0_30, %c0_31], %81 {strides = array<i32>} : memref<1x4x16x16xf32, #tpu.memory_space<vmem>>, vector<1x1x16x16xf32>,
    %82 = arith.truncf %77 : vector<24x24xf32> to vector<24x24xbf16>
    %cst_32 = arith.constant dense<0.000000e+00> : vector<24x16xf32>
    %83 = tpu.matmul %82, %66, %cst_32 {dimension_numbers = #tpu.dot_dimension_numbers<[1], [0], [0], [1], [0, 0, 1, 1], [], []>} : vector<24x24xbf16>, vector<24x16xbf16>, vector<24x16xf32> -> vector<24x16xf32>
    %84 = vector.extract_strided_slice %7 {offsets = [0, 48], sizes = [24, 16], strides = [1, 1]} : vector<24x192xf32> to vector<24x16xf32>
    %cst_33 = arith.constant 2.500000e-01 : f32
    %85 = vector.broadcast %cst_33 : f32 to vector<24x16xf32>
    %86 = arith.mulf %84, %85 : vector<24x16xf32>
    %87 = arith.truncf %86 : vector<24x16xf32> to vector<24x16xbf16>
    %88 = vector.extract_strided_slice %7 {offsets = [0, 112], sizes = [24, 16], strides = [1, 1]} : vector<24x192xf32> to vector<24x16xf32>
    %89 = arith.truncf %88 : vector<24x16xf32> to vector<24x16xbf16>
    %90 = vector.extract_strided_slice %7 {offsets = [0, 176], sizes = [24, 16], strides = [1, 1]} : vector<24x192xf32> to vector<24x16xf32>
    %91 = arith.truncf %90 : vector<24x16xf32> to vector<24x16xbf16>
    %cst_34 = arith.constant dense<0.000000e+00> : vector<24x24xf32>
    %92 = tpu.matmul %87, %89, %cst_34 {dimension_numbers = #tpu.dot_dimension_numbers<[1], [1], [0], [0], [0, 0, 1, 0], [], []>} : vector<24x16xbf16>, vector<24x16xbf16>, vector<24x24xf32> -> vector<24x24xf32>
    %cst_35 = arith.constant dense<0xFF800000> : vector<24xf32>
    %93 = vector.multi_reduction <maximumf>, %92, %cst_35 [1] : vector<24x24xf32> to vector<24xf32>
    %94 = vector.shape_cast %93 : vector<24xf32> to vector<24x1xf32>
    %95 = vector.broadcast %94 : vector<24x1xf32> to vector<24x24xf32>
    %96 = arith.subf %92, %95 : vector<24x24xf32>
    %97 = math.exp %96 : vector<24x24xf32>
    %cst_36 = arith.constant dense<0.000000e+00> : vector<24xf32>
    %98 = vector.multi_reduction <add>, %97, %cst_36 [1] : vector<24x24xf32> to vector<24xf32>
    %99 = vector.shape_cast %98 : vector<24xf32> to vector<24x1xf32>
    %100 = tpu.reciprocal %99 {approx = true} : vector<24x1xf32> -> vector<24x1xf32>
    %101 = vector.broadcast %100 : vector<24x1xf32> to vector<24x24xf32>
    %102 = arith.mulf %97, %101 : vector<24x24xf32>
    %103 = vector.extract_strided_slice %102 {offsets = [8, 8], sizes = [16, 16], strides = [1, 1]} : vector<24x24xf32> to vector<16x16xf32>
    %c0_37 = arith.constant 0 : index
    %c3 = arith.constant 3 : index
    %c0_38 = arith.constant 0 : index
    %c0_39 = arith.constant 0 : index
    %104 = vector.load %arg7[%c0_37, %c3, %c0_38, %c0_39] : memref<1x4x16x16xf32, #tpu.memory_space<vmem>>, vector<1x1x16x16xf32>
    %105 = vector.shape_cast %104 : vector<1x1x16x16xf32> to vector<16x16xf32>
    %106 = vector.shape_cast %103 : vector<16x16xf32> to vector<1x1x16x16xf32>
    tpu.vector_store %arg7[%c0_37, %c3, %c0_38, %c0_39], %106 {strides = array<i32>} : memref<1x4x16x16xf32, #tpu.memory_space<vmem>>, vector<1x1x16x16xf32>,
    %107 = arith.truncf %102 : vector<24x24xf32> to vector<24x24xbf16>
    %cst_40 = arith.constant dense<0.000000e+00> : vector<24x16xf32>
    %108 = tpu.matmul %107, %91, %cst_40 {dimension_numbers = #tpu.dot_dimension_numbers<[1], [0], [0], [1], [0, 0, 1, 1], [], []>} : vector<24x24xbf16>, vector<24x16xbf16>, vector<24x16xf32> -> vector<24x16xf32>
    %109 = tpu.concatenate %33, %58, %83, %108 in 1 : vector<24x16xf32>, vector<24x16xf32>, vector<24x16xf32>, vector<24x16xf32> -> vector<24x64xf32>
    %110 = arith.truncf %109 : vector<24x64xf32> to vector<24x64xbf16>
    %cst_41 = arith.constant dense<0.000000e+00> : vector<24x64xf32>
    %111 = tpu.matmul %110, %8, %cst_41 {dimension_numbers = #tpu.dot_dimension_numbers<[1], [0], [0], [1], [0, 0, 1, 1], [], []>} : vector<24x64xbf16>, vector<64x64xbf16>, vector<24x64xf32> -> vector<24x64xf32>
    %c0_42 = arith.constant 0 : index
    %c0_43 = arith.constant 0 : index
    %112 = vector.load %arg5[%c0_42, %c0_43] : memref<1x64xf32, #tpu.memory_space<vmem>>, vector<1x64xf32>
    %113 = vector.broadcast %112 : vector<1x64xf32> to vector<24x64xf32>
    %114 = arith.addf %111, %113 : vector<24x64xf32>
    %c0_44 = arith.constant 0 : index
    %c0_45 = arith.constant 0 : index
    %c0_46 = arith.constant 0 : index
    %115 = vector.load %arg6[%c0_44, %c0_45, %c0_46] : memref<1x24x64xf32, #tpu.memory_space<vmem>>, vector<1x24x64xf32>
    %116 = vector.shape_cast %115 : vector<1x24x64xf32> to vector<24x64xf32>
    %117 = vector.shape_cast %114 : vector<24x64xf32> to vector<1x24x64xf32>
    tpu.vector_store %arg6[%c0_44, %c0_45, %c0_46], %117 {strides = array<i32>} : memref<1x24x64xf32, #tpu.memory_space<vmem>>, vector<1x24x64xf32>,
    return
  }
  func.func @transform_0(%arg0: i32) -> (i32, i32, i32) {
    %c0_i32 = arith.constant 0 : i32
    %c0_i32_0 = arith.constant 0 : i32
    %c0_i32_1 = arith.constant 0 : i32
    return %arg0, %c0_i32, %c0_i32_0 : i32, i32, i32
  }
  func.func @transform_1(%arg0: i32) -> (i32, i32) {
    %c0_i32 = arith.constant 0 : i32
    %c0_i32_0 = arith.constant 0 : i32
    %c0_i32_1 = arith.constant 0 : i32
    return %c0_i32, %c0_i32_0 : i32, i32
  }
  func.func @transform_2(%arg0: i32) -> (i32, i32) {
    %c0_i32 = arith.constant 0 : i32
    %c0_i32_0 = arith.constant 0 : i32
    %c0_i32_1 = arith.constant 0 : i32
    return %c0_i32, %c0_i32_0 : i32, i32
  }
  func.func @transform_3(%arg0: i32) -> (i32, i32) {
    %c0_i32 = arith.constant 0 : i32
    %c0_i32_0 = arith.constant 0 : i32
    %c0_i32_1 = arith.constant 0 : i32
    return %c0_i32, %c0_i32_0 : i32, i32
  }
  func.func @transform_4(%arg0: i32) -> (i32, i32) {
    %c0_i32 = arith.constant 0 : i32
    %c0_i32_0 = arith.constant 0 : i32
    %c0_i32_1 = arith.constant 0 : i32
    return %c0_i32, %c0_i32_0 : i32, i32
  }
  func.func @transform_5(%arg0: i32) -> (i32, i32, i32) {
    %c0_i32 = arith.constant 0 : i32
    %c0_i32_0 = arith.constant 0 : i32
    %c0_i32_1 = arith.constant 0 : i32
    return %arg0, %c0_i32, %c0_i32_0 : i32, i32, i32
  }
  func.func @transform_6(%arg0: i32) -> (i32, i32, i32, i32) {
    %c0_i32 = arith.constant 0 : i32
    %c0_i32_0 = arith.constant 0 : i32
    %c0_i32_1 = arith.constant 0 : i32
    %c0_i32_2 = arith.constant 0 : i32
    return %arg0, %c0_i32, %c0_i32_0, %c0_i32_1 : i32, i32, i32, i32
  }
}

</mosaic_0001>

<bundles_post_ra>
// kernel: tpu_custom_call.1
= control target key start
LH: loop header
LB: loop body
LE: loop exit
PB: predicated region body
PF: predicated region fallthrough
CT: control target
= control target key end

     0   :  { %s2159_s0 = inlined_call_operand.hbm [shape: f32[2,24,64], index: 0, kind: input, shape index: {}]   ;;  %s2160_s1 = inlined_call_operand.hbm [shape: bf16[64,192], index: 1, kind: input, shape index: {}]   ;;  %s2161_s2 = inlined_call_operand.hbm [shape: f32[1,192], index: 2, kind: input, shape index: {}]   ;;  %s2162_s3 = inlined_call_operand.hbm [shape: bf16[64,64], index: 3, kind: input, shape index: {}]   ;;  %s2163_s4 = inlined_call_operand.vmem [shape: f32[1,64], index: 4, kind: input, shape index: {}]   ;;  %s2164_s5 = inlined_call_operand.hbm [shape: f32[2,24,64], index: 5, kind: output, shape index: {0}]   ;;  %s2165_s6 = inlined_call_operand.hbm [shape: f32[2,4,16,16], index: 6, kind: output, shape index: {1}]  }
   0x1   :  { %2168 = sst [smem:[#allocation18_spill]] %s2160_s1 }
   0x2   :  { %2169 = sst [smem:[#allocation19_spill]] %s2161_s2 }
   0x3   :  { %12 = vsyncpa [#allocation3], 0 }
   0x4   :  { %14 = vsyncpa [#allocation3 + $0x1], 0 }
   0x5   :  { %15 = vsyncpa [#allocation6], 0 }
   0x6   :  { %16 = vsyncpa [#allocation9], 0 }
   0x7   :  { %17 = vsyncpa [#allocation4], 0 }
   0x8   :  { %19 = vsyncpa [#allocation4 + $0x1], 0 }
   0x9   :  { %20 = vsyncpa [#allocation12], 0 }
   0xa   :  { %22 = vsyncpa [#allocation12 + $0x1], 0  ;;  %s1746_s21 = smov 0   ;;  %s1748_s22 = smov 0  }
   0xb   :  { %s1750_s23 = smov 0   ;;  %s1752_s24 = smov 0  }
   0xc LB: > { %s1767_s25 = sadd.s32 4294967295, %s1692_s24   ;;  %s1191_s26 = sadd.s32 4294967294, %s1692_s24   ;;  %s1692_s24 = sphi %s1752_s24, %s2184_s24   ;;  %s1688_s23 = sphi %s1750_s23, %s2183_s23   ;;  %s1684_s22 = sphi %s1748_s22, %s2182_s22   ;;  %s1680_s21 = sphi %s1746_s21, %s2181_s21  }
   0xd   : > { %p48_p0 = scmp.ne.s32.totalorder %s1684_s22, %s1680_s21  ;;  %p49_p1 = scmp.eq.s32.totalorder %s1767_s25, 0 }
   0xe   : > { %p156_p2 = scmp.eq.s32.totalorder %s1767_s25, 1  ;;  %p162_p3 = scmp.eq.s32.totalorder %s1191_s26, 1 }
   0xf   : > { %p1776_p4 = por %p49_p1, %p48_p0  ;;  %p1192_p5 = scmp.ge.s32.totalorder %s1692_s24, 1 }
  0x10   : > { %p1781_p6 = por %p162_p3, %p48_p0  ;;  %p195_p7 = scmp.lt.s32.totalorder %s1692_s24, 3 }
  0x11   : > { %s2172_s1 = sld [smem:[#allocation18_spill]]  ;;  %s1694_s9 = smov [#allocation5]  }
  0x12   : > { %p1789_p8 = pnand %p1192_p5, %p195_p7  ;;  %s208_s10 = sshll.u32 %s1694_s9, 4  ;;  %s209_s10 = int_to_ptr.vmem [resolvable:$true] %s208_s10 }
  0x13   : > { %s2175_s2 = sld [smem:[#allocation19_spill]]  ;;  %s2166_s15 = smov 128  }
  0x14   : > { %p1324_p9 = pneg %p1789_p8  ;;  %s2167_s16 = smov 8  }
  0x15   : > { %s1697_s17 = smov [#allocation7]   ;;  %s232_s26 = sshll.u32 %s2162_s3, 4  ;;  %s233_s26 = int_to_ptr.hbm [resolvable:$true] %s232_s26 }
  0x16   : > { %p1797_p10 = pnand %p1324_p9, %p49_p1  ;;  %s223_s18 = sshll.u32 %s1697_s17, 4  ;;  %s224_s18 = int_to_ptr.vmem [resolvable:$true] %s223_s18 }
  0x17   : > { %s206_s7 = sshll.u32 %s2172_s1, 4  ;;  %s1698_s29 = smov [#allocation8]   ;;  %s207_s7 = int_to_ptr.hbm [resolvable:$true] %s206_s7 }
  0x18   : > { %1327 = dma.hbm_to_vmem [thread:$0]  (!%p1797_p10), %s207_s7, 1024, %s209_s10, [#allocation6], %s2166_s15, %s2166_s15, %s2167_s16  }
  0x19   : > { %s221_s14 = sshll.u32 %s2175_s2, 4  ;;  %s234_s30 = sshll.u32 %s1698_s29, 4  ;;  %s222_s14 = int_to_ptr.hbm [resolvable:$true] %s221_s14  ;;  %s235_s30 = int_to_ptr.vmem [resolvable:$true] %s234_s30 }
  0x1a   : > { %1330 = dma.hbm_to_vmem [thread:$0]  (!%p1797_p10), %s222_s14, 32, %s224_s18, [#allocation6]  }
  0x1b   : > { %s1699_s7 = smov 64   ;;  %s1700_s9 = smov 4  }
  0x1c   : > { %1333 = dma.hbm_to_vmem [thread:$0]  (!%p1797_p10), %s233_s26, 512, %s235_s30, [#allocation9], %s1699_s7, %s1699_s7, %s1700_s9  }
  0x1d   : > { %s1818_s10 = sadd.s32 1, %s1692_s24   ;;  %s35_s13 = sadd.s32 1, %s1688_s23 }
  0x1e   : > { %s32_s12 = ssub.s32 %s1692_s24, %s1818_s10  ;;  %p42_p13 = scmp.ne.s32.totalorder %s1688_s23, %s1684_s22 }
  0x1f   : > { %p33_p12 = scmp.eq.s32.totalorder %s32_s12, 0  ;;  %p43_p0 = scmp.eq.s32.totalorder %s1692_s24, 0 }
  0x20   : > { %p1348_p3 = scmp.lt.s32.totalorder %s1692_s24, 2  ;;  %p1832_p7 = por %p156_p2, %p42_p13 }
  0x21   : > { %s1828_s14 = scalar_select %p33_p12, %s1688_s23, %s35_s13  }
  0x22   : > { %p44_p5 = por %p43_p0, %p42_p13  ;;  %s251_s18 = sand.u32 1, %s1688_s23  }
  0x23   : > { %s1303_s11 = smul.u32 24, %s1692_s24  ;;  %s252_s13 = scalar_lea.sflag [#allocation3], %s251_s18 }
  0x24   : > { %s1302_s19 = smul.u32 24, %s251_s18  ;;  %p1841_p9 = pnand %p1348_p3, %p44_p5 }
  0x25   : > { %s260_s29 = scalar_lea.hbm %s2159_s0, %s1303_s11  ;;  %s1563_s26 = scalar_lea.hbm %s2159_s0, 48 }
  0x26   : > { %s261_s7 = sshll.u32 %s260_s29, 4  ;;  %s255_s9 = scalar_lea.vmem [#allocation2], %s1302_s19  ;;  %s262_s7 = int_to_ptr.hbm [resolvable:$true] %s261_s7 }
  0x27   : > { %s263_s12 = sshll.u32 %s255_s9, 4  ;;  %s1556_s15 = sshra.s32 %s262_s7, 4  ;;  %s264_s12 = int_to_ptr.vmem [resolvable:$true] %s263_s12  ;;  %s1557_s15 = int_to_ptr.hbm [resolvable:$true] %s1556_s15 }
  0x28   : > { %s1558_s16 = scalar_lea.hbm %s1557_s15, 24  ;;  %p1560_p10 = pneg %p1841_p9 }
  0x29   : > { %p1559_p2 = scmp.ne.s32.totalorder %s1557_s15, %s1558_s16  ;;  %p1564_p0 = scmp.lt.s32.totalorder %s1557_s15, %s2159_s0 }
  0x2a   : > { %p1565_p3 = scmp.lt.s32.totalorder %s1563_s26, %s1558_s16 }
  0x2b   : > { %p1561_p12 = pnand %p1560_p10, %p1559_p2 }
  0x2c   : > { %p1566_p5 = por %p1565_p3, %p1564_p0 }
  0x2d   : > { %p1562_p13 = pneg %p1561_p12 }
  0x2f   : > { %p1567_p11 = pnand %p1566_p5, %p1562_p13 }
  0x31   : > { %1570 = shalt.err (!%p1567_p11)
}
  0x32   : > { %s2178_s18 = smov 8   ;;  %s2179_s19 = smov 128  }
  0x33   : > { %1337 = dma.hbm_to_vmem [thread:$0]  (!%p1841_p9), %s262_s7, 384, %s264_s12, %s252_s13, %s2179_s19, %s2179_s19, %s2178_s18  }
  0x34   : > { %275 = sbr.rel (%p1789_p8) target bundleno = 1779 (0x6f3), region = 40  ;;  %s1861_s29 = sand.u32 (!%p1789_p8), 1, %s1684_s22  }
  0x35   : > { %s1304_s1 = smul.u32 (!%p1789_p8), 24, %s1861_s29  ;;  %s278_s2 = scalar_lea.sflag (!%p1789_p8), [#allocation3], %s1861_s29 }
  0x37   : > { %s281_s15 = scalar_lea.vmem (!%p1789_p8), [#allocation2], %s1304_s1 }
  0x39   : > { %1659 = dma.done.wait (%p1776_p4), %s278_s2, 384  }
  0x3a   : > { %1661 = vsyncadd (%p1776_p4), %s278_s2, 4294966912 }
  0x3b   : > { %1663 = dma.done.wait (%p49_p1), [#allocation6], 1056  }
  0x3c   : > { %1665 = vsyncadd (%p49_p1), [#allocation6], 4294966240 }
  0x3d   : > { %1667 = dma.done.wait (%p49_p1), [#allocation9], 512  }
  0x3e   : > { %1669 = vsyncadd (%p49_p1), [#allocation9], 4294966784  ;;  %v1229_v0 = vld [vmem:[#allocation5 + $0x30] sm:$0xf]  ;;  %v1292_v1 = vld [vmem:[#allocation5 + $0x34] sm:$0xf0] }
  0x3f   : > { %v1221_v2 = vld [vmem:[#allocation5 + $0x20] sm:$0xf]  ;;  %v1230_v3 = vor.u32 %v1292_v1, %v1229_v0  ;;  %v1290_v4 = vld [vmem:[#allocation5 + $0x24] sm:$0xf0]  ;;  %v1213_v6 = vld [vmem:[#allocation5 + $0x10] sm:$0xf] }
  0x40   : > { %v1222_v5 = vor.u32 %v1290_v4, %v1221_v2  ;;  %v1288_v7 = vld [vmem:[#allocation5 + $0x14] sm:$0xf0]  ;;  %v1205_v9 = vld [vmem:[#allocation5] sm:$0xf]  ;;  %v1286_v10 = vld [vmem:[#allocation5 + $0x4] sm:$0xf0] }
  0x41   : > { %402 = vmatpush.bf16.msra.mxu0 %v1230_v3  ;;  %1298 = vmatpush.bf16.msra.mxu2 %v1230_v3  ;;  %v1214_v8 = vor.u32 %v1288_v7, %v1213_v6  ;;  %v1206_v11 = vor.u32 %v1286_v10, %v1205_v9  ;;  %v332_v12 = vld [vmem:[%s281_s15] sm:$0xff]  ;;  %v333_v13 = vld [vmem:[%s281_s15 + $0x8] sm:$0xff]  ;;  %v334_v14 = vld [vmem:[%s281_s15 + $0x10] sm:$0xff]  ;;  %vm391_vm0 = vcmask 523264   ;;  %s1701_s27 = smov 64   ;;  %vm457_vm1 = vcmask 130048  }
  0x42   : > { %v335_v15 = vpack.c.bf16 %v333_v13, %v332_v12  ;;  %v336_v16 = vpack.c.bf16 %v334_v14, %v334_v14  ;;  %v1881_v17 = vld [vmem:[#allocation7] sm:$0x3]  ;;  %v1291_v37 = vld [vmem:[#allocation5 + $0x34] sm:$0xf]  ;;  %v1231_v38 = vld [vmem:[#allocation5 + $0x38] sm:$0xf0] }
  0x43   : > { %v347_v19 = vperm.slane %v1881_v17, 0  ;;  %v1289_v39 = vld [vmem:[#allocation5 + $0x24] sm:$0xf]  ;;  %v1234_v40 = vor.u32 %v1291_v37, %v1231_v38  ;;  %v1223_v41 = vld [vmem:[#allocation5 + $0x28] sm:$0xf0]  ;;  %vm488_vm2 = vcmask 195584  }
  0x44   : > { %v1226_v42 = vor.u32 %v1289_v39, %v1223_v41  ;;  %v1287_v43 = vld [vmem:[#allocation5 + $0x14] sm:$0xf]  ;;  %v1215_v44 = vld [vmem:[#allocation5 + $0x18] sm:$0xf0]  ;;  %v1285_v47 = vld [vmem:[#allocation5 + $0x4] sm:$0xf] }
  0x45   : > { %403 = vmatpush.bf16.msra.mxu0 %v1222_v5  ;;  %1299 = vmatpush.bf16.msra.mxu2 %v1222_v5  ;;  %v1218_v45 = vor.u32 %v1287_v43, %v1215_v44  ;;  %v1207_v48 = vld [vmem:[#allocation5 + $0x8] sm:$0xf0]  ;;  %s1702_s8 = smov 48   ;;  %s1703_s16 = smov 16   ;;  %vm540_vm3 = vcmask 1043456   ;;  %vm953_vm4 = vcmask 261120  }
  0x46   : > { %420 = vmatpush.bf16.msra.mxu1 %v1234_v40  ;;  %v1210_v50 = vor.u32 %v1285_v47, %v1207_v48  ;;  %s1704_s30 = smov 112   ;;  %s1705_s7 = smov 32   ;;  %vm957_vm5 = vcmask 392192  }
  0x47   : > { %s1706_s9 = smov 96   ;;  %s1707_s12 = smov 80  }
  0x48   : > { %s1708_s13 = smov 120   ;;  %s1202_s11 = sshll.u32 %s1861_s29, 6 }
  0x49   : > { %404 = vmatpush.bf16.msra.mxu0 %v1214_v8  ;;  %1300 = vmatpush.bf16.msra.mxu2 %v1214_v8  ;;  %s2031_s20 = scalar_lea.vmem [#allocation11], %s1202_s11  ;;  %s1297_s26 = sshll.u32 %s1767_s25, 6 }
  0x4a   : > { %421 = vmatpush.bf16.msra.mxu1 %v1226_v42  ;;  %s1052_s2 = scalar_lea.hbm %s2165_s6, %s1297_s26  ;;  %s1053_s15 = sshll.u32 %s2031_s20, 4  ;;  %s1054_s15 = int_to_ptr.vmem [resolvable:$true] %s1053_s15 }
  0x4d   : > { %405 = vmatpush.bf16.msra.mxu0 %v1206_v11  ;;  %1301 = vmatpush.bf16.msra.mxu2 %v1206_v11  ;;  %v348_v11 = vperm.slane %v1881_v17, 1 }
  0x4e   : > { %422 = vmatpush.bf16.msra.mxu1 %v1218_v45 }
  0x50   : > { %1235 = vmatmul.msk.bf16.vlgmr.msra.gmra.mxu0 %vm391_vm0, %v335_v15  ;;  %1236 = vmatmul.msk.bf16.vlgmr.msra.gmra.mxu2 %vm391_vm0, %v336_v16 }
  0x52   : > { %423 = vmatpush.bf16.msra.mxu1 %v1210_v50 }
  0x55   : > { %1237 = vmatmul.msk.bf16.vlgmr.msra.gmra.mxu1 %vm391_vm0, %v335_v15 }
  0x65   : > { %1238 = vmatmul.msk.bf16.gmra.mxu1 %vm391_vm0, %v336_v16 }
  0xcd   : > { %v407_v18 = vpop.f32.mrf.mxu0 }
  0xce   : > { %v408_v21 = vadd.f32 %v407_v18, %v347_v19 }
  0xd0   : > { %v442_v26 = vmul.f32 0.25, %v408_v21 }
  0xd2   : > { %v425_v7 = vpop.f32.mrf.mxu1 }
  0xd3   : > { %v412_v20 = vpop.f32.mrf.mxu2  ;;  %v426_v14 = vadd.f32 %v425_v7, %v348_v11 }
  0xd4   : > { %v413_v22 = vadd.f32 %v412_v20, %v347_v19 }
  0xd5   : > { %v409_v23 = vpop.f32.mrf.mxu0 }
  0xd6   : > { %v1884_v24 = vpack.c.bf16 %v413_v22, %v413_v22  ;;  %v410_v25 = vadd.f32 %v409_v23, %v347_v19  ;;  %v444_v35 = vmul.f32 0.25, %v413_v22 }
  0xd8   : > { %v443_v27 = vmul.f32 0.25, %v410_v25  ;;  %455 = vrot.lane.b32.xlu0 %v1884_v24, %s1701_s27  ;;  %v1889_v30 = vpack.c.bf16 %v410_v25, %v408_v21  ;;  %v1896_v36 = vpack.c.bf16 %v444_v35, %v444_v35 }
  0xda   : > { %v1887_v28 = vpack.c.bf16 %v443_v27, %v442_v26  ;;  %v427_v8 = vpop.f32.mrf.mxu1 }
  0xdb   : > { %v414_v29 = vpop.f32.mrf.mxu2  ;;  %v428_v15 = vadd.f32 %v427_v8, %v348_v11 }
  0xdd   : > { %v1937_v18 = vpack.c.bf16 %v428_v15, %v426_v14 }
  0xe0   : > { %453 = vrot.lane.b32.xlu0 %v1889_v30, %s1701_s27  ;;  %s1055_s27 = sshll.u32 %s1052_s2, 4  ;;  %s1056_s27 = int_to_ptr.hbm [resolvable:$true] %s1055_s27 }
  0xe2   : > { %v430_v9 = vpop.f32.mrf.mxu1 }
  0xe3   : > { %v431_v12 = vadd.f32 %v430_v9, %v348_v11 }
  0xe5   : > { %v1933_v13 = vpack.c.bf16 %v431_v12, %v431_v12 }
  0xe7   : > { %v542_v16 = vsel %vm540_vm3, %v1933_v13, 0 }
  0xe8   : > { %550 = vmatpush.bf16.msra.mxu3 %v542_v16 }
  0xea   : > { %v432_v10 = vpop.f32.mrf.mxu1 }
  0xec   : > { %551 = vmatpush.bf16.msra.mxu3 %v1937_v18 }
 0x14a   : > { %v456_v31 = vpop.permute.xlu0 %455 }
 0x14b   : > { %v468_v32 = vsel %vm457_vm1, %v456_v31, 0 }
 0x14c   : > { %476 = vmatpush.bf16.xpose.msrb.mxu2 %v468_v32 }
 0x152   : > { %v454_v33 = vpop.permute.xlu0 %453 }
 0x153   : > { %v465_v34 = vsel %vm457_vm1, %v454_v33, 0 }
 0x154   : > { %477 = vmatpush.bf16.xpose.msrb.mxu2 %v465_v34 }
 0x15b   : > { %1239 = vmatmul.msk.bf16.vlgmr.msrb.gmra.mxu2 %vm457_vm1, %v1887_v28 }
 0x16b   : > { %1240 = vmatmul.msk.bf16.gmra.mxu2 %vm457_vm1, %v1896_v36 }
 0x1de   : > { %v479_v46 = vpop.f32.mrf.mxu2 }
 0x1df   : > { %v489_v49 = vsel %vm488_vm2, %v479_v46, -inf }
 0x1e0   : > { %490 = vmax.xlane.f32.xlu1 %v489_v49 }
 0x1e6   : > { %v481_v51 = vpop.f32.mrf.mxu2 }
 0x1e7   : > { %v492_v52 = vsel %vm488_vm2, %v481_v51, -inf }
 0x1e8   : > { %493 = vmax.xlane.f32.xlu1 %v492_v52 }
 0x1ee   : > { %v484_v53 = vpop.f32.mrf.mxu2 }
 0x1ef   : > { %v495_v54 = vsel %vm488_vm2, %v484_v53, -inf }
 0x1f0   : > { %496 = vmax.xlane.f32.xlu2 %v495_v54 }
 0x1f6   : > { %v486_v55 = vpop.f32.mrf.mxu2 }
 0x253   : > { %v491_v56 = vpop.xlane.xlu1 %490 }
 0x254   : > { %v498_v57 = vsub.f32 %v479_v46, %v491_v56 }
 0x256   : > { %v501_v58 = vmul.f32 1.442695, %v498_v57 }
 0x258   : > { %1418 = vpow2.f32 %v501_v58 }
 0x25b   : > { %v494_v59 = vpop.xlane.xlu1 %493 }
 0x25c   : > { %v499_v60 = vsub.f32 %v481_v51, %v494_v59 }
 0x25e   : > { %v1419_v61 = vpop.eup %1418  ;;  %v503_v62 = vmul.f32 1.442695, %v499_v60 }
 0x25f   : > { %v507_v63 = vsel %vm488_vm2, %v1419_v61, 0.0 }
 0x260   : > { %1420 = vpow2.f32 %v503_v62  ;;  %508 = vadd.xlane.f32.xlu2 %v507_v63 }
 0x263   : > { %v497_v0 = vpop.xlane.xlu2 %496 }
 0x264   : > { %v500_v1 = vsub.f32 %v484_v53, %v497_v0 }
 0x266   : > { %v1421_v2 = vpop.eup %1420  ;;  %v505_v3 = vmul.f32 1.442695, %v500_v1 }
 0x267   : > { %v510_v4 = vsel %vm488_vm2, %v1421_v2, 0.0 }
 0x268   : > { %1422 = vpow2.f32 %v505_v3  ;;  %511 = vadd.xlane.f32.xlu0 %v510_v4 }
 0x26e   : > { %v1423_v5 = vpop.eup %1422 }
 0x26f   : > { %v513_v6 = vsel %vm488_vm2, %v1423_v5, 0.0 }
 0x270   : > { %514 = vadd.xlane.f32.xlu1 %v513_v6 }
 0x278   : > { %570 = vrot.lane.b32.xlu2 %v1884_v24, %s1702_s8 }
 0x27c   : > { %802 = vrot.lane.b32.xlu0 %v1889_v30, %s1703_s16 }
 0x280   : > { %564 = vrot.lane.b32.xlu2 %v1887_v28, %s1704_s30 }
 0x288   : > { %688 = vrot.lane.b32.xlu2 %v1884_v24, %s1705_s7 }
 0x289   : > { %568 = vrot.lane.b32.xlu1 %v1889_v30, %s1702_s8 }
 0x290   : > { %804 = vrot.lane.b32.xlu2 %v1884_v24, %s1703_s16 }
 0x291   : > { %566 = vrot.lane.b32.xlu1 %v1896_v36, %s1704_s30 }
 0x298   : > { %682 = vrot.lane.b32.xlu2 %v1887_v28, %s1706_s9 }
 0x299   : > { %686 = vrot.lane.b32.xlu1 %v1889_v30, %s1705_s7 }
 0x2a0   : > { %684 = vrot.lane.b32.xlu2 %v1896_v36, %s1706_s9 }
 0x2a1   : > { %798 = vrot.lane.b32.xlu1 %v1887_v28, %s1707_s12 }
 0x2a9   : > { %800 = vrot.lane.b32.xlu1 %v1896_v36, %s1707_s12 }
 0x2d3   : > { %v509_v19 = vpop.xlane.xlu2 %508 }
 0x2d4   : > { %1424 = vrcp.f32 %v509_v19 }
 0x2da   : > { %v1425_v22 = vpop.eup %1424 }
 0x2db   : > { %v512_v20 = vpop.xlane.xlu0 %511  ;;  %v571_v21 = vpop.permute.xlu2 %570  ;;  %v519_v25 = vmul.f32 %v1425_v22, %v1419_v61 }
 0x2dc   : > { %1426 = vrcp.f32 %v512_v20  ;;  %v582_v17 = vsel %vm457_vm1, %v571_v21, 0 }
 0x2dd   : > { %590 = vmatpush.bf16.xpose.msrb.mxu3 %v582_v17 }
 0x2e2   : > { %v1427_v23 = vpop.eup %1426 }
 0x2e3   : > { %v565_v24 = vpop.permute.xlu2 %564  ;;  %v1941_v26 = vmul.f32 %v1427_v23, %v1421_v2  ;;  %v515_v27 = vpop.xlane.xlu1 %514 }
 0x2e4   : > { %1428 = vrcp.f32 %v515_v27 }
 0x2e5   : > { %v532_v28 = vpack.c.bf16 %v1941_v26, %v519_v25 }
 0x2e7   : > { %1241 = vmatmul.msk.bf16.vlgmr.msra.gmra.mxu3 %vm488_vm2, %v532_v28 }
 0x2ea   : > { %v1429_v31 = vpop.eup %1428 }
 0x2eb   : > { %v689_v29 = vpop.permute.xlu2 %688  ;;  %v1946_v32 = vmul.f32 %v1429_v31, %v1423_v5 }
 0x2ec   : > { %v700_v30 = vsel %vm457_vm1, %v689_v29, 0 }
 0x2ed   : > { %708 = vmatpush.bf16.xpose.msrb.mxu1 %v700_v30  ;;  %v533_v33 = vpack.c.bf16 %v1946_v32, %v1946_v32 }
 0x2ee   : > { %v803_v38 = vpop.permute.xlu0 %802 }
 0x2ef   : > { %v813_v40 = vsel %vm457_vm1, %v803_v38, 0 }
 0x2f3   : > { %v805_v34 = vpop.permute.xlu2 %804 }
 0x2f4   : > { %v816_v37 = vsel %vm457_vm1, %v805_v34, 0 }
 0x2f7   : > { %1242 = vmatmul.msk.bf16.gmra.mxu3 %vm488_vm2, %v533_v33 }
 0x2fb   : > { %v569_v35 = vpop.permute.xlu1 %568  ;;  %v683_v43 = vpop.permute.xlu2 %682 }
 0x2fc   : > { %v579_v36 = vsel %vm457_vm1, %v569_v35, 0 }
 0x2fd   : > { %591 = vmatpush.bf16.xpose.msrb.mxu3 %v579_v36 }
 0x303   : > { %v567_v39 = vpop.permute.xlu1 %566  ;;  %v685_v44 = vpop.permute.xlu2 %684 }
 0x305   : > { %824 = vmatpush.bf16.xpose.msra.mxu3 %v816_v37 }
 0x307   : > { %1243 = vmatmul.msk.bf16.vlgmr.msrb.gmra.mxu3 %vm457_vm1, %v565_v24 }
 0x30b   : > { %v687_v41 = vpop.permute.xlu1 %686 }
 0x30c   : > { %v697_v42 = vsel %vm457_vm1, %v687_v41, 0 }
 0x30d   : > { %825 = vmatpush.bf16.xpose.msra.mxu3 %v813_v40  ;;  %709 = vmatpush.bf16.xpose.msrb.mxu1 %v697_v42 }
 0x313   : > { %v799_v45 = vpop.permute.xlu1 %798 }
 0x314   : > { %1249 = vmatmul.msk.bf16.vlgmr.msrb.gmra.mxu1 %vm457_vm1, %v683_v43 }
 0x317   : > { %1244 = vmatmul.msk.bf16.gmra.mxu3 %vm457_vm1, %v567_v39 }
 0x31b   : > { %v801_v46 = vpop.permute.xlu1 %800 }
 0x324   : > { %1250 = vmatmul.msk.bf16.gmra.mxu1 %vm457_vm1, %v685_v44 }
 0x327   : > { %1255 = vmatmul.msk.bf16.vlgmr.msra.gmra.mxu3 %vm457_vm1, %v799_v45 }
 0x337   : > { %1256 = vmatmul.msk.bf16.gmra.mxu3 %vm457_vm1, %v801_v46 }
 0x36a   : > { %v1961_v47 = vpop.f32.mrf.mxu3 }
 0x372   : > { %v1963_v48 = vpop.f32.mrf.mxu3 }
 0x37a   : > { %v1965_v49 = vpop.f32.mrf.mxu3 }
 0x382   : > { %v560_v50 = vpop.f32.mrf.mxu3 }
 0x38a   : > { %v593_v51 = vpop.f32.mrf.mxu3 }
 0x38b   : > { %v602_v57 = vsel %vm488_vm2, %v593_v51, -inf }
 0x391   : > { %v711_v52 = vpop.f32.mrf.mxu1 }
 0x392   : > { %v595_v53 = vpop.f32.mrf.mxu3  ;;  %v720_v54 = vsel %vm488_vm2, %v711_v52, -inf }
 0x393   : > { %721 = vmax.xlane.f32.xlu0 %v720_v54  ;;  %v605_v0 = vsel %vm488_vm2, %v595_v53, -inf }
 0x399   : > { %v713_v55 = vpop.f32.mrf.mxu1 }
 0x39a   : > { %v1968_v56 = vpop.f32.mrf.mxu3  ;;  %v723_v58 = vsel %vm488_vm2, %v713_v55, -inf }
 0x39b   : > { %603 = vmax.xlane.f32.xlu0 %v602_v57  ;;  %724 = vmax.xlane.f32.xlu2 %v723_v58  ;;  %v608_v16 = vsel %vm488_vm2, %v1968_v56, -inf }
 0x3a1   : > { %v716_v59 = vpop.f32.mrf.mxu1 }
 0x3a2   : > { %v600_v60 = vpop.f32.mrf.mxu3  ;;  %v726_v61 = vsel %vm488_vm2, %v716_v59, -inf }
 0x3a3   : > { %727 = vmax.xlane.f32.xlu2 %v726_v61 }
 0x3a9   : > { %v718_v62 = vpop.f32.mrf.mxu1 }
 0x3aa   : > { %v1973_v63 = vpop.f32.mrf.mxu3 }
 0x3ab   : > { %606 = vmax.xlane.f32.xlu2 %v605_v0  ;;  %v836_v24 = vsel %vm488_vm2, %v1973_v63, -inf }
 0x3af   : > { %650 = vrot.lane.b32.xlu0 %v1937_v18, %s1704_s30 }
 0x3b2   : > { %v1978_v1 = vpop.f32.mrf.mxu3 }
 0x3b3   : > { %v839_v4 = vsel %vm488_vm2, %v1978_v1, -inf }
 0x3ba   : > { %v1980_v2 = vpop.f32.mrf.mxu3 }
 0x3bb   : > { %v842_v30 = vsel %vm488_vm2, %v1980_v2, -inf }
 0x3c2   : > { %v834_v3 = vpop.f32.mrf.mxu3 }
 0x3c3   : > { %652 = vrot.lane.b32.xlu2 %v1933_v13, %s1704_s30 }
 0x3d9   : > { %840 = vmax.xlane.f32.xlu0 %v839_v4 }
 0x406   : > { %v722_v5 = vpop.xlane.xlu0 %721 }
 0x407   : > { %v729_v6 = vsub.f32 %v711_v52, %v722_v5 }
 0x409   : > { %v732_v7 = vmul.f32 1.442695, %v729_v6 }
 0x40b   : > { %1430 = vpow2.f32 %v732_v7 }
 0x40e   : > { %v725_v8 = vpop.xlane.xlu2 %724  ;;  %v604_v20 = vpop.xlane.xlu0 %603 }
 0x40f   : > { %v730_v9 = vsub.f32 %v713_v55, %v725_v8  ;;  %v611_v22 = vsub.f32 %v593_v51, %v604_v20 }
 0x411   : > { %v1986_v10 = vpop.eup %1430  ;;  %v734_v11 = vmul.f32 1.442695, %v730_v9  ;;  %v614_v25 = vmul.f32 1.442695, %v611_v22 }
 0x412   : > { %v738_v12 = vsel %vm488_vm2, %v1986_v10, 0.0 }
 0x413   : > { %739 = vadd.xlane.f32.xlu1 %v738_v12  ;;  %1432 = vpow2.f32 %v734_v11 }
 0x416   : > { %v728_v14 = vpop.xlane.xlu2 %727 }
 0x417   : > { %v731_v36 = vsub.f32 %v716_v59, %v728_v14 }
 0x419   : > { %v1990_v15 = vpop.eup %1432  ;;  %v736_v37 = vmul.f32 1.442695, %v731_v36 }
 0x41a   : > { %v741_v19 = vsel %vm488_vm2, %v1990_v15, 0.0 }
 0x41b   : > { %609 = vmax.xlane.f32.xlu1 %v608_v16  ;;  %742 = vadd.xlane.f32.xlu2 %v741_v19 }
 0x41e   : > { %v607_v21 = vpop.xlane.xlu2 %606 }
 0x41f   : > { %v612_v17 = vsub.f32 %v595_v53, %v607_v21 }
 0x421   : > { %v616_v23 = vmul.f32 1.442695, %v612_v17  ;;  %v651_v33 = vpop.permute.xlu0 %650 }
 0x423   : > { %1434 = vpow2.f32 %v616_v23  ;;  %837 = vmax.xlane.f32.xlu1 %v836_v24 }
 0x424   : > { %1436 = vpow2.f32 %v614_v25 }
 0x425   : > { %1438 = vpow2.f32 %v736_v37 }
 0x426   : > { %v653_v27 = vpop.permute.xlu2 %652 }
 0x427   : > { %v662_v28 = vsel %vm540_vm3, %v653_v27, 0 }
 0x428   : > { %670 = vmatpush.bf16.msrb.mxu0 %v662_v28 }
 0x429   : > { %v1435_v29 = vpop.eup %1434 }
 0x42a   : > { %v623_v31 = vsel %vm488_vm2, %v1435_v29, 0.0  ;;  %v1437_v34 = vpop.eup %1436 }
 0x42b   : > { %843 = vmax.xlane.f32.xlu1 %v842_v30  ;;  %624 = vadd.xlane.f32.xlu0 %v623_v31  ;;  %v620_v35 = vsel %vm488_vm2, %v1437_v34, 0.0  ;;  %v2005_v38 = vpop.eup %1438 }
 0x42c   : > { %671 = vmatpush.bf16.msrb.mxu0 %v651_v33  ;;  %v744_v39 = vsel %vm488_vm2, %v2005_v38, 0.0 }
 0x433   : > { %621 = vadd.xlane.f32.xlu1 %v620_v35  ;;  %766 = vrot.lane.b32.xlu2 %v1937_v18, %s1706_s9 }
 0x44c   : > { %v841_v51 = vpop.xlane.xlu0 %840 }
 0x44d   : > { %v846_v0 = vsub.f32 %v1978_v1, %v841_v51 }
 0x44f   : > { %v850_v3 = vmul.f32 1.442695, %v846_v0 }
 0x45c   : > { %745 = vadd.xlane.f32.xlu2 %v744_v39 }
 0x474   : > { %526 = vrot.lane.b32.xlu2 %v1946_v32, %s1708_s13 }
 0x486   : > { %v740_v40 = vpop.xlane.xlu1 %739 }
 0x48e   : > { %v610_v41 = vpop.xlane.xlu1 %609  ;;  %v743_v62 = vpop.xlane.xlu2 %742 }
 0x48f   : > { %v613_v42 = vsub.f32 %v1968_v56, %v610_v41 }
 0x491   : > { %v618_v43 = vmul.f32 1.442695, %v613_v42 }
 0x493   : > { %1440 = vpow2.f32 %v618_v43 }
 0x496   : > { %v838_v44 = vpop.xlane.xlu1 %837 }
 0x497   : > { %v845_v45 = vsub.f32 %v1973_v63, %v838_v44  ;;  %v767_v63 = vpop.permute.xlu2 %766 }
 0x499   : > { %v1441_v46 = vpop.eup %1440  ;;  %v848_v50 = vmul.f32 1.442695, %v845_v45 }
 0x49a   : > { %v626_v52 = vsel %vm488_vm2, %v1441_v46, 0.0 }
 0x49b   : > { %1442 = vpow2.f32 %v848_v50  ;;  %627 = vadd.xlane.f32.xlu1 %v626_v52 }
 0x49e   : > { %v844_v53 = vpop.xlane.xlu1 %843  ;;  %v625_v32 = vpop.xlane.xlu0 %624 }
 0x49f   : > { %1444 = vrcp.f32 %v625_v32  ;;  %v847_v5 = vsub.f32 %v1980_v2, %v844_v53 }
 0x4a1   : > { %v2014_v54 = vpop.eup %1442  ;;  %v852_v6 = vmul.f32 1.442695, %v847_v5 }
 0x4a2   : > { %v854_v55 = vsel %vm488_vm2, %v2014_v54, 0.0 }
 0x4a3   : > { %855 = vadd.xlane.f32.xlu0 %v854_v55 }
 0x4a5   : > { %v1445_v57 = vpop.eup %1444 }
 0x4a6   : > { %v622_v56 = vpop.xlane.xlu1 %621  ;;  %v2018_v59 = vmul.f32 %v1445_v57, %v1435_v29  ;;  %v1296_v57 = vld [vmem:[#allocation8 + $0x18] sm:$0xff] }
 0x4a7   : > { %1446 = vrcp.f32 %v622_v56  ;;  %1001 = vmatpush.bf16.msra.mxu1 %v1296_v57 }
 0x4a8   : > { %1448 = vpow2.f32 %v850_v3 }
 0x4a9   : > { %1450 = vpow2.f32 %v852_v6 }
 0x4ad   : > { %v1447_v58 = vpop.eup %1446 }
 0x4ae   : > { %v632_v60 = vmul.f32 %v1447_v58, %v1437_v34  ;;  %v1295_v58 = vld [vmem:[#allocation8 + $0x10] sm:$0xff] }
 0x4af   : > { %1002 = vmatpush.bf16.msra.mxu1 %v1295_v58 }
 0x4b0   : > { %v646_v61 = vpack.c.bf16 %v2018_v59, %v632_v60  ;;  %v1293_v60 = vld [vmem:[#allocation8] sm:$0xff] }
 0x4b2   : > { %1247 = vmatmul.msk.bf16.vlgmr.msrb.gmra.mxu0 %vm488_vm2, %v646_v61 }
 0x4b4   : > { %768 = vrot.lane.b32.xlu1 %v1933_v13, %s1706_s9 }
 0x4b7   : > { %884 = vrot.lane.b32.xlu0 %v1933_v13, %s1707_s12  ;;  %v1449_v13 = vpop.eup %1448 }
 0x4b8   : > { %v1451_v8 = vpop.eup %1450 }
 0x4b9   : > { %v860_v1 = vsel %vm488_vm2, %v1451_v8, 0.0 }
 0x4bf   : > { %882 = vrot.lane.b32.xlu0 %v1937_v18, %s1707_s12  ;;  %v857_v18 = vsel %vm488_vm2, %v1449_v13, 0.0  ;;  %s1606_s12 = scalar_lea.hbm %s2165_s6, 128 }
 0x4cf   : > { %v746_v4 = vpop.xlane.xlu2 %745 }
 0x4d7   : > { %v527_v7 = vpop.permute.xlu2 %526 }
 0x4d8   : > { %531 = vst.msk [vmem:[%s2031_s20 + $0x8] sm:$0xff] %vm457_vm1, %v527_v7 }
 0x4de   : > { %858 = vadd.xlane.f32.xlu1 %v857_v18 }
 0x4e6   : > { %861 = vadd.xlane.f32.xlu1 %v860_v1 }
 0x50e   : > { %v628_v9 = vpop.xlane.xlu1 %627 }
 0x50f   : > { %1452 = vrcp.f32 %v628_v9 }
 0x510   : > { %1454 = vrcp.f32 %v743_v62 }
 0x511   : > { %1456 = vrcp.f32 %v740_v40 }
 0x512   : > { %1458 = vrcp.f32 %v746_v4 }
 0x515   : > { %v1453_v11 = vpop.eup %1452 }
 0x516   : > { %v2037_v2 = vmul.f32 %v1453_v11, %v1441_v46  ;;  %v856_v14 = vpop.xlane.xlu0 %855  ;;  %v1455_v16 = vpop.eup %1454 }
 0x517   : > { %v1457_v21 = vpop.eup %1456  ;;  %v751_v17 = vmul.f32 %v1455_v16, %v1990_v15  ;;  %1460 = vrcp.f32 %v856_v14 }
 0x518   : > { %v647_v12 = vpack.c.bf16 %v2037_v2, %v2037_v2  ;;  %v750_v24 = vmul.f32 %v1457_v21, %v1986_v10  ;;  %v1459_v29 = vpop.eup %1458 }
 0x519   : > { %v752_v33 = vmul.f32 %v1459_v29, %v2005_v38 }
 0x51a   : > { %1248 = vmatmul.msk.bf16.gmra.mxu0 %vm488_vm2, %v647_v12  ;;  %v764_v25 = vpack.c.bf16 %v751_v17, %v750_v24 }
 0x51b   : > { %v765_v15 = vpack.c.bf16 %v752_v33, %v752_v33 }
 0x51d   : > { %v1461_v34 = vpop.eup %1460 }
 0x51e   : > { %v866_v36 = vmul.f32 %v1461_v34, %v2014_v54 }
 0x526   : > { %v769_v19 = vpop.permute.xlu1 %768 }
 0x527   : > { %v778_v20 = vsel %vm540_vm3, %v769_v19, 0 }
 0x528   : > { %786 = vmatpush.bf16.msra.mxu2 %v778_v20 }
 0x529   : > { %v885_v22 = vpop.permute.xlu0 %884 }
 0x52a   : > { %v894_v23 = vsel %vm540_vm3, %v885_v22, 0 }
 0x52b   : > { %902 = vmatpush.bf16.msra.mxu0 %v894_v23 }
 0x52c   : > { %787 = vmatpush.bf16.msra.mxu2 %v767_v63 }
 0x52f   : > { %v673_v27 = vpop.f32.mrf.mxu0  ;;  %1253 = vmatmul.msk.bf16.vlgmr.msra.gmra.mxu2 %vm488_vm2, %v764_v25 }
 0x531   : > { %v883_v28 = vpop.permute.xlu0 %882 }
 0x532   : > { %903 = vmatpush.bf16.msra.mxu0 %v883_v28 }
 0x537   : > { %v675_v30 = vpop.f32.mrf.mxu0 }
 0x538   : > { %v1407_v31 = vpack.i.bf16 %v675_v30, %v673_v27 }
 0x53a   : > { %1408 = vrot.lane.b32.xlu0 %v1407_v31, %s1703_s16 }
 0x53f   : > { %1254 = vmatmul.msk.bf16.gmra.mxu2 %vm488_vm2, %v765_v15 }
 0x551   : > { %v859_v10 = vpop.xlane.xlu1 %858 }
 0x552   : > { %1462 = vrcp.f32 %v859_v10 }
 0x558   : > { %v1463_v35 = vpop.eup %1462 }
 0x559   : > { %v867_v37 = vmul.f32 %v1463_v35, %v1449_v13  ;;  %v862_v40 = vpop.xlane.xlu1 %861 }
 0x55a   : > { %1464 = vrcp.f32 %v862_v40 }
 0x55b   : > { %v880_v39 = vpack.c.bf16 %v867_v37, %v866_v36 }
 0x55d   : > { %1259 = vmatmul.msk.bf16.vlgmr.msra.gmra.mxu0 %vm488_vm2, %v880_v39 }
 0x560   : > { %v1465_v41 = vpop.eup %1464 }
 0x561   : > { %v868_v38 = vmul.f32 %v1465_v41, %v1451_v8 }
 0x563   : > { %v881_v42 = vpack.c.bf16 %v868_v38, %v868_v38 }
 0x56d   : > { %1260 = vmatmul.msk.bf16.gmra.mxu0 %vm488_vm2, %v881_v42 }
 0x597   : > { %v678_v43 = vpop.f32.mrf.mxu0 }
 0x59f   : > { %v680_v44 = vpop.f32.mrf.mxu0 }
 0x5ac   : > { %v1409_v61 = vpop.permute.xlu0 %1408 }
 0x5ad   : > { %v1410_v63 = vunpack.i.l.bf16 %v1409_v61 }
 0x5af   : > { %v950_v6 = vsel %vm457_vm1, %v1961_v47, %v1410_v63 }
 0x5b2   : > { %v789_v45 = vpop.f32.mrf.mxu2 }
 0x5ba   : > { %v791_v46 = vpop.f32.mrf.mxu2 }
 0x5bb   : > { %v1402_v50 = vpack.i.bf16 %v791_v46, %v789_v45 }
 0x5bd   : > { %1403 = vrot.lane.b32.xlu1 %v1402_v50, %s1705_s7 }
 0x5c2   : > { %v794_v51 = vpop.f32.mrf.mxu2 }
 0x5ca   : > { %v796_v52 = vpop.f32.mrf.mxu2 }
 0x5da   : > { %v905_v53 = vpop.f32.mrf.mxu0 }
 0x5e2   : > { %v907_v54 = vpop.f32.mrf.mxu0 }
 0x5e3   : > { %v1412_v32 = vpack.i.bf16 %v907_v54, %v905_v53 }
 0x5e5   : > { %1413 = vrot.lane.b32.xlu0 %v1412_v32, %s1702_s8 }
 0x5ea   : > { %v910_v55 = vpop.f32.mrf.mxu0 }
 0x5eb   : > { %945 = vrot.lane.b32.xlu1 %v910_v55, %s1702_s8  ;;  %s1024_s8 = scalar_lea.sflag [#allocation12], %s1861_s29 }
 0x5ed   : > { %921 = vrot.lane.b32.xlu0 %v678_v43, %s1703_s16  ;;  %s1600_s16 = sshra.s32 %s1056_s27, 4  ;;  %s1601_s16 = int_to_ptr.hbm [resolvable:$true] %s1600_s16 }
 0x5ee   : > { %s1602_s30 = scalar_lea.hbm %s1601_s16, 64  ;;  %p1607_p11 = scmp.lt.s32.totalorder %s1601_s16, %s2165_s6 }
 0x5ef   : > { %p1603_p1 = scmp.ne.s32.totalorder %s1601_s16, %s1602_s30  ;;  %p1608_p9 = scmp.lt.s32.totalorder %s1606_s12, %s1602_s30 }
 0x5f1   : > { %p1604_p4 = pnand %p1603_p1, %p1832_p7  ;;  %p1609_p2 = por %p1608_p9, %p1607_p11 }
 0x5f2   : > { %v912_v56 = vpop.f32.mrf.mxu0 }
 0x5f3   : > { %637 = vrot.lane.b32.xlu1 %v2018_v59, %s1708_s13  ;;  %v1294_v59 = vld [vmem:[#allocation8 + $0x8] sm:$0xff]  ;;  %p1605_p8 = pneg %p1604_p4 }
 0x5f4   : > { %1003 = vmatpush.bf16.msra.mxu1 %v1294_v59 }
 0x5f5   : > { %933 = vrot.lane.b32.xlu0 %v794_v51, %s1705_s7  ;;  %p1610_p10 = pnand %p1609_p2, %p1605_p8 }
 0x5f8   : > { %1004 = vmatpush.bf16.msra.mxu1 %v1293_v60 }
 0x5fb   : > { %755 = vrot.lane.b32.xlu1 %v751_v17, %s1708_s13 }
 0x5fd   : > { %524 = vrot.lane.b32.xlu0 %v1941_v26, %s1708_s13  ;;  %v1411_v26 = vunpack.i.h.bf16 %v1409_v61 }
 0x5ff   : > { %v951_v5 = vsel %vm457_vm1, %v1963_v48, %v1411_v26 }
 0x603   : > { %871 = vrot.lane.b32.xlu1 %v867_v37, %s1708_s13 }
 0x605   : > { %639 = vrot.lane.b32.xlu0 %v2037_v2, %s1708_s13 }
 0x60d   : > { %757 = vrot.lane.b32.xlu0 %v752_v33, %s1708_s13 }
 0x615   : > { %873 = vrot.lane.b32.xlu0 %v868_v38, %s1708_s13 }
 0x62f   : > { %v1404_v62 = vpop.permute.xlu1 %1403 }
 0x630   : > { %v1406_v0 = vunpack.i.h.bf16 %v1404_v62  ;;  %v1405_v3 = vunpack.i.l.bf16 %v1404_v62 }
 0x632   : > { %v955_v18 = vsel %vm953_vm4, %v951_v5, %v1406_v0  ;;  %v954_v8 = vsel %vm953_vm4, %v950_v6, %v1405_v3 }
 0x657   : > { %v1414_v4 = vpop.permute.xlu0 %1413 }
 0x658   : > { %v1416_v7 = vunpack.i.h.bf16 %v1414_v4  ;;  %v1415_v13 = vunpack.i.l.bf16 %v1414_v4 }
 0x65a   : > { %v958_v1 = vsel %vm957_vm5, %v954_v8, %v1415_v13  ;;  %v959_v9 = vsel %vm957_vm5, %v955_v18, %v1416_v7 }
 0x65b   : > { %v961_v11 = vpack.c.bf16 %v959_v9, %v958_v1 }
 0x65d   : > { %v946_v2 = vpop.permute.xlu1 %945  ;;  %1277 = vmatmul.msk.bf16.vlgmr.msra.gmra.mxu1 %vm391_vm0, %v961_v11 }
 0x65f   : > { %v922_v48 = vpop.permute.xlu0 %921 }
 0x660   : > { %v952_v12 = vsel %vm457_vm1, %v1965_v49, %v922_v48 }
 0x665   : > { %v638_v47 = vpop.permute.xlu1 %637 }
 0x666   : > { %1245 = vst.msk [vmem:[%s2031_s20 + $0x10] sm:$0xff] %vm457_vm1, %v638_v47 }
 0x667   : > { %v934_v14 = vpop.permute.xlu0 %933 }
 0x668   : > { %v956_v16 = vsel %vm953_vm4, %v952_v12, %v934_v14 }
 0x669   : > { %v960_v19 = vsel %vm957_vm5, %v956_v16, %v946_v2 }
 0x66a   : > { %v962_v20 = vpack.c.bf16 %v960_v19, %v960_v19 }
 0x66d   : > { %v756_v21 = vpop.permute.xlu1 %755  ;;  %1278 = vmatmul.msk.bf16.gmra.mxu1 %vm391_vm0, %v962_v20 }
 0x66e   : > { %1251 = vst.msk [vmem:[%s2031_s20 + $0x20] sm:$0xff] %vm457_vm1, %v756_v21 }
 0x66f   : > { %v525_v17 = vpop.permute.xlu0 %524 }
 0x670   : > { %530 = vst.msk [vmem:[%s2031_s20] sm:$0xff] %vm457_vm1, %v525_v17 }
 0x675   : > { %v872_v22 = vpop.permute.xlu1 %871 }
 0x676   : > { %1257 = vst.msk [vmem:[%s2031_s20 + $0x30] sm:$0xff] %vm457_vm1, %v872_v22 }
 0x677   : > { %v640_v49 = vpop.permute.xlu0 %639 }
 0x678   : > { %1246 = vst.msk [vmem:[%s2031_s20 + $0x18] sm:$0xff] %vm457_vm1, %v640_v49 }
 0x67f   : > { %v758_v23 = vpop.permute.xlu0 %757 }
 0x680   : > { %1252 = vst.msk [vmem:[%s2031_s20 + $0x28] sm:$0xff] %vm457_vm1, %v758_v23 }
 0x687   : > { %v874_v24 = vpop.permute.xlu0 %873 }
 0x688   : > { %1258 = vst.msk [vmem:[%s2031_s20 + $0x38] sm:$0xff] %vm457_vm1, %v874_v24 }
 0x689   : > { %1613 = shalt.err (!%p1610_p10)
}
 0x68a   : > { %s1709_s20 = smov 128   ;;  %s1710_s26 = smov 8   ;;  %v1417_v25 = vld [vmem:[%s2163_s4] ss:$0 sm:$0xff] }
 0x68b   : > { %1321 = dma.vmem_to_hbm [thread:$0]  (%p1832_p7), %s1054_s15, 1024, %s1056_s27, %s1024_s8, %s1709_s20, %s1709_s20, %s1710_s26  }
 0x68c   : > { %s323_s2 = scalar_lea.vmem [#allocation10], %s1304_s1  ;;  %s1305_s16 = smul.u32 24, %s1767_s25 }
 0x68d   : > { %s1036_s27 = sshll.u32 %s323_s2, 4  ;;  %s1019_s1 = scalar_lea.sflag [#allocation4], %s1861_s29  ;;  %s1037_s27 = int_to_ptr.vmem [resolvable:$true] %s1036_s27 }
 0x68e   : > { %s1035_s15 = scalar_lea.hbm %s2164_s5, %s1305_s16  ;;  %s1634_s11 = scalar_lea.hbm %s2164_s5, 48 }
 0x68f   : > { %s1038_s8 = sshll.u32 %s1035_s15, 4  ;;  %s1039_s8 = int_to_ptr.hbm [resolvable:$true] %s1038_s8 }
 0x690   : > { %s1628_s9 = sshra.s32 %s1039_s8, 4  ;;  %s1629_s9 = int_to_ptr.hbm [resolvable:$true] %s1628_s9 }
 0x691   : > { %s1630_s25 = scalar_lea.hbm %s1629_s9, 24  ;;  %p1635_p3 = scmp.lt.s32.totalorder %s1629_s9, %s2164_s5 }
 0x692   : > { %p1631_p12 = scmp.ne.s32.totalorder %s1629_s9, %s1630_s25  ;;  %p1636_p5 = scmp.lt.s32.totalorder %s1634_s11, %s1630_s25 }
 0x694   : > { %p1632_p13 = pnand %p1631_p12, %p1832_p7  ;;  %p1637_p1 = por %p1636_p5, %p1635_p3 }
 0x696   : > { %p1633_p0 = pneg %p1632_p13 }
 0x698   : > { %p1638_p4 = pnand %p1637_p1, %p1633_p0 }
 0x6da   : > { %v1006_v27 = vpop.f32.mrf.mxu1 }
 0x6db   : > { %v1007_v28 = vadd.f32 %v1417_v25, %v1006_v27 }
 0x6dd   : > { %1015 = vst.msk [vmem:[%s323_s2] sm:$0xff] %vm391_vm0, %v1007_v28 }
 0x6e2   : > { %v1008_v29 = vpop.f32.mrf.mxu1 }
 0x6e3   : > { %v1009_v30 = vadd.f32 %v1417_v25, %v1008_v29 }
 0x6e5   : > { %1016 = vst.msk [vmem:[%s323_s2 + $0x8] sm:$0xff] %vm391_vm0, %v1009_v30 }
 0x6ea   : > { %v1011_v31 = vpop.f32.mrf.mxu1 }
 0x6eb   : > { %v1012_v33 = vadd.f32 %v1417_v25, %v1011_v31 }
 0x6ed   : > { %1017 = vst.msk [vmem:[%s323_s2 + $0x10] sm:$0xff] %vm391_vm0, %v1012_v33 }
 0x6ee   : > { %1641 = shalt.err (!%p1638_p4)
}
 0x6ef   : > { %1320 = dma.vmem_to_hbm [thread:$0]  (%p1832_p7), %s1037_s27, 384, %s1039_s8, %s1019_s1, %s1709_s20, %s1709_s20, %s1710_s26  }
 0x6f2   : > { %v1013_v15 = vpop.f32.mrf.mxu1 }
 0x6f3 PF: > { %s1070_s29 = sand.u32 1, %s1680_s21   ;;  %p2180_p8 = scmp.ge.s32.totalorder %s1692_s24, 2 }
 0x6f4   : > { %s1071_s2 = scalar_lea.sflag [#allocation4], %s1070_s29 }
 0x6f5   : > { %p1339_p11 = pnand %p2180_p8, %p1781_p6 }
 0x6f7   : > { %p1340_p9 = pneg %p1339_p11 }
 0x6f9   : > { %1671 = dma.done.wait (%p1340_p9), %s1071_s2, 384  }
 0x6fa   : > { %1673 = vsyncadd (%p1340_p9), %s1071_s2, 4294966912  ;;  %s1081_s16 = scalar_lea.sflag [#allocation12], %s1070_s29 }
 0x6fb   : > { %1675 = dma.done.wait (%p1340_p9), %s1081_s16, 1024  }
 0x6fc   : > { %1677 = vsyncadd (%p1340_p9), %s1081_s16, 4294966272  ;;  %p25_p7 = scmp.ge.s32.totalorder %s1818_s10, 4   ;;  %s2181_s21 = smov %s1684_s22 }
 0x6fd   : > { %s2182_s22 = smov %s1688_s23  ;;  %s2183_s23 = smov %s1828_s14 }
 0x6fe   : > { %s2184_s24 = smov %s1818_s10  ;;  %27 = sbr.rel (!%p25_p7) target bundleno = 12 (0xc), region = 117 }
 0x703   :  { %1087 = vsyncpa [#allocation3], 1 }
 0x704   :  { %1089 = vsyncpa [#allocation3 + $0x1], 1 }
 0x705   :  { %1090 = vsyncpa [#allocation6], 1 }
 0x706   :  { %1091 = vsyncpa [#allocation9], 1 }
 0x707   :  { %1092 = vsyncpa [#allocation4], 1 }
 0x708   :  { %1094 = vsyncpa [#allocation4 + $0x1], 1 }
 0x709   :  { %1095 = vsyncpa [#allocation12], 1 }
 0x70a   :  { %1097 = vsyncpa [#allocation12 + $0x1], 1 }

</bundles_post_ra>
